<compile_context>
chip_gen: v7x
topology: tpu7x:2x2x1
jax: 0.10.0
libtpu: 0.0.40
codegen_flags: <defaults>
</compile_context>

<pallas_src>
import jax
import jax.numpy as jnp
from jax.experimental import pallas as pl
from jax.experimental.pallas import tpu as pltpu


# ----------------------- quantizer constants (deterministic) ----------------
IN_BITS = 4
OUT_BITS = 4
S_IN = 0.25                                   # input scale factor
S_OUT = 0.125                                 # output scale factor
IN_LEVELS = float(2 ** IN_BITS - 1)           # unsigned range [0, 15]
OUT_NEG = -float(2 ** (OUT_BITS - 1))         # signed range [-8, 7]
OUT_POS = float(2 ** (OUT_BITS - 1) - 1)


def _round_up(a: int, m: int) -> int:
    return ((a + m - 1) // m) * m


# ------------------------------- kernel body --------------------------------
def _sparse_linear_neq_kernel(x_ref, w_ref, b_ref, o_ref, xq_ref):
    # ---- input_quant once per batch tile (j == 0), cached in VMEM scratch.
    #      The quantized values are 4-bit codes * S_IN (power of two), so the
    #      bf16 cache is lossless. x block index depends only on i, so the x
    #      DMA is already skipped across j; this skips the VPU work too. ----
    @pl.when(pl.program_id(1) == 0)
    def _():
        x = x_ref[...].astype(jnp.float32)
        xq = jnp.clip(jnp.round(x * (1.0 / S_IN)), 0.0, IN_LEVELS) * S_IN
        xq_ref[...] = xq.astype(jnp.bfloat16)

    # ---- SparseLinear: mask already folded into the (K, N) bf16 weight;
    #      MXU matmul with f32 accumulation, then bias add. ----
    y = jnp.dot(xq_ref[...], w_ref[...],
                preferred_element_type=jnp.float32)              # (tb, tn) f32
    y = y + b_ref[...]                                           # bias (1, tn)

    # ---- output_quant (signed fake-quant); codes * S_OUT are exact in bf16.
    yq = jnp.clip(jnp.round(y * (1.0 / S_OUT)), OUT_NEG, OUT_POS) * S_OUT
    o_ref[...] = yq.astype(o_ref.dtype)


# ------------------- one-time parameter preprocessing -----------------------
def prepare_params(weight, mask, bias):
    """Fold mask, transpose to MXU-natural (K, N), cast weight to bf16, and
    (only when out_features >= 128) pad the out dimension to a lane-dense
    multiple of 128.  Call ONCE at model load; the per-call wrapper does no
    weight work.

    weight: (out_features, in_features) f32   (PyTorch nn.Linear layout)
    mask:   (out_features, in_features) f32
    bias:   (out_features,)             f32
    returns (w_kn_bf16, bias_row_f32, out_features)
    """
    out_f, in_f = weight.shape
    w_kn = (weight * mask).T.astype(jnp.bfloat16)                # (in_f, out_f)

    # Lane-dense padding of the out dim only pays off when out_f >= 128
    # (unmasked vst); for tiny LogicNets layers keep the full-dim block and a
    # masked store instead of a per-call output slice.
    out_pad = _round_up(out_f, 128) if out_f >= 128 else out_f
    if out_pad != out_f:
        w_kn = jnp.pad(w_kn, ((0, 0), (0, out_pad - out_f)))
        bias = jnp.pad(bias, (0, out_pad - out_f))
    bias_row = bias.reshape(1, out_pad).astype(jnp.float32)
    return w_kn, bias_row, out_f


def _vmem_bytes(tb, in_f, tn, x_itemsize):
    """Per-step VMEM residency with (8, 128) layout padding and the default
    double-buffering of pipelined operands."""
    def tile(r, c, item):
        return _round_up(r, 8) * _round_up(c, 128) * item
    b = 0
    b += 2 * tile(tb, in_f, x_itemsize)      # x input (double-buffered)
    b += 2 * tile(in_f, tn, 2)               # bf16 weight
    b += 2 * tile(1, tn, 4)                  # bias
    b += 2 * tile(tb, tn, 2)                 # bf16 output
    b += tile(tb, in_f, 2)                   # xq scratch
    return b


# ------------------------------ per-call wrapper -----------------------------
def sparse_linear_neq(x, w_kn, bias_row, out_features, *, tb=256, tn=None):
    """Fused NEQ forward.

    x:        (B, in_features) f32 (or bf16 from a previous quantized layer)
    w_kn:     (in_features, out_pad) bf16   from prepare_params
    bias_row: (1, out_pad) f32              from prepare_params
    returns   (B, out_features) bf16  (fake-quant codes * S_OUT, exact)
    """
    B, in_f = x.shape
    in_f_w, out_pad = w_kn.shape
    assert in_f_w == in_f

    # --- tile selection ---
    # tn: feed the full 256-wide MXU on v6e/v7x when the out dim allows it;
    #     128 otherwise; full dim for tiny layers (block == full array dim).
    if tn is None:
        if out_pad >= 256 and out_pad % 256 == 0:
            tn = 256
        elif out_pad % 128 == 0:
            tn = 128
        else:
            tn = out_pad
    # tb: as large as useful, but keep >= 2 batch tiles when possible so the
    #     "parallel" axis can be sharded across both v7x TensorCores.
    tb = min(tb, B)
    if B >= 256 and B // tb < 2:
        tb = max(128, _round_up((B + 1) // 2, 8))
    if tb != B and tb % 8 != 0:              # block 2nd-minor dim must be 8-aligned
        tb = B

    grid = (pl.cdiv(B, tb), out_pad // tn)

    vmem_limit = max(2 * _vmem_bytes(tb, in_f, tn, x.dtype.itemsize),
                     8 * 1024 * 1024)

    out = pl.pallas_call(
        _sparse_linear_neq_kernel,
        out_shape=jax.ShapeDtypeStruct((B, out_pad), jnp.bfloat16),
        grid_spec=pltpu.PrefetchScalarGridSpec(
            num_scalar_prefetch=0,
            grid=grid,
            in_specs=[
                pl.BlockSpec((tb, in_f), lambda i, j: (i, 0)),     # x tile
                pl.BlockSpec((in_f, tn), lambda i, j: (0, j)),     # weight tile
                pl.BlockSpec((1, tn), lambda i, j: (0, j)),        # bias tile
            ],
            out_specs=pl.BlockSpec((tb, tn), lambda i, j: (i, j)),
            scratch_shapes=[pltpu.VMEM((tb, in_f), jnp.bfloat16)],  # xq cache
        ),
        compiler_params=pltpu.CompilerParams(
            # j axis is "arbitrary": the xq scratch is (re)written at j == 0
            # and carried across the j loop within each batch tile.
            dimension_semantics=("parallel", "arbitrary"),
            vmem_limit_bytes=vmem_limit,
        ),
    )(x, w_kn, bias_row)

    if out_pad != out_features:
        out = out[:, :out_features]
    return out


# ----------------------------- pure-JAX reference ---------------------------
def _reference_f32(x, weight, mask, bias):
    """Exact PyTorch-semantics reference (f32 weights)."""
    xq = jnp.clip(jnp.round(x / S_IN), 0.0, IN_LEVELS) * S_IN
    y = xq @ (weight * mask).T + bias
    return jnp.clip(jnp.round(y / S_OUT), OUT_NEG, OUT_POS) * S_OUT


if __name__ == "__main__":
    key = jax.random.PRNGKey(0)
    # Small LogicNets-like layer: 32->32, fan-in 4, batch 256 (2 batch tiles).
    B, IN_F, OUT_F, FAN_IN = 256, 32, 32, 4

    k_x, k_w, k_b, k_m = jax.random.split(key, 4)

    x = jax.random.normal(k_x, (B, IN_F), dtype=jnp.float32)
    weight = jax.random.normal(k_w, (OUT_F, IN_F), dtype=jnp.float32) * 0.2
    bias = jax.random.normal(k_b, (OUT_F,), dtype=jnp.float32) * 0.1

    # Fan-in sparsity mask: each output neuron connects to FAN_IN inputs
    # (deterministic per-row top-k of random scores).
    scores = jax.random.uniform(k_m, (OUT_F, IN_F))
    thresh = jnp.sort(scores, axis=1)[:, -FAN_IN][:, None]
    mask = (scores >= thresh).astype(jnp.float32)

    # One-time weight preprocessing (model-load time, not per forward call).
    w_kn, bias_row, out_f = prepare_params(weight, mask, bias)
    jax.block_until_ready((w_kn, bias_row))

    out = sparse_linear_neq(x, w_kn, bias_row, out_f)
    jax.block_until_ready(out)

    ref = _reference_f32(x, weight, mask, bias)
    assert out.shape == (B, OUT_F)
    assert out.dtype == jnp.bfloat16
    # bf16 weight cast can flip borderline pre-quant activations across one
    # output quant boundary; the quantized output codes themselves are exact
    # in bf16, so the kernel differs from the exact-f32 reference by at most
    # one output quant level.
    assert jnp.max(jnp.abs(out.astype(jnp.float32) - ref)) <= S_OUT + 1e-5

    print("KERNEL_OK")
</pallas_src>

<mosaic_0001>
module attributes {stable_mosaic.version = 11 : i64} {
  func.func @_sparse_linear_neq_kernel(%arg0: i32, %arg1: i32, %arg2: memref<128x32xf32, #tpu.memory_space<vmem>>, %arg3: memref<32x32xbf16, #tpu.memory_space<vmem>>, %arg4: memref<1x32xf32, #tpu.memory_space<vmem>>, %arg5: memref<128x32xbf16, #tpu.memory_space<vmem>>, %arg6: memref<128x32xbf16, #tpu.memory_space<vmem>>) attributes {dimension_semantics = [#tpu.dimension_semantics<parallel>, #tpu.dimension_semantics<arbitrary>], iteration_bounds = array<i64: 2, 1>, scalar_prefetch = 0 : i64, scratch_operands = 1 : i64, tpu.core_type = #tpu.core_type<tc>, window_params = [{transform_indices = @transform_0, window_bounds = array<i64: 128, 32>}, {transform_indices = @transform_1, window_bounds = array<i64: 32, 32>}, {transform_indices = @transform_2, window_bounds = array<i64: 1, 32>}, {transform_indices = @transform_3, window_bounds = array<i64: 128, 32>}]} {
    %c0_i32 = arith.constant 0 : i32
    %0 = arith.cmpi eq, %arg1, %c0_i32 : i32
    %1 = arith.extui %0 : i1 to i32
    %c0_i32_0 = arith.constant 0 : i32
    %2 = arith.cmpi ne, %1, %c0_i32_0 : i32
    scf.if %2 {
      %c0_12 = arith.constant 0 : index
      %c0_13 = arith.constant 0 : index
      %20 = vector.load %arg2[%c0_12, %c0_13] : memref<128x32xf32, #tpu.memory_space<vmem>>, vector<128x32xf32>
      %cst_14 = arith.constant 4.000000e+00 : f32
      %21 = vector.broadcast %cst_14 : f32 to vector<128x32xf32>
      %22 = arith.mulf %20, %21 : vector<128x32xf32>
      %23 = math.roundeven %22 : vector<128x32xf32>
      %cst_15 = arith.constant 0.000000e+00 : f32
      %cst_16 = arith.constant 1.500000e+01 : f32
      %24 = vector.broadcast %cst_15 : f32 to vector<128x32xf32>
      %25 = arith.maximumf %24, %23 : vector<128x32xf32>
      %26 = vector.broadcast %cst_16 : f32 to vector<128x32xf32>
      %27 = arith.minimumf %26, %25 : vector<128x32xf32>
      %cst_17 = arith.constant 2.500000e-01 : f32
      %28 = vector.broadcast %cst_17 : f32 to vector<128x32xf32>
      %29 = arith.mulf %27, %28 : vector<128x32xf32>
      %30 = arith.truncf %29 : vector<128x32xf32> to vector<128x32xbf16>
      %c0_18 = arith.constant 0 : index
      %c0_19 = arith.constant 0 : index
      %31 = vector.load %arg6[%c0_18, %c0_19] : memref<128x32xbf16, #tpu.memory_space<vmem>>, vector<128x32xbf16>
      tpu.vector_store %arg6[%c0_18, %c0_19], %30 {strides = array<i32>} : memref<128x32xbf16, #tpu.memory_space<vmem>>, vector<128x32xbf16>,
    } else {
    }
    %c0 = arith.constant 0 : index
    %c0_1 = arith.constant 0 : index
    %3 = vector.load %arg6[%c0, %c0_1] : memref<128x32xbf16, #tpu.memory_space<vmem>>, vector<128x32xbf16>
    %c0_2 = arith.constant 0 : index
    %c0_3 = arith.constant 0 : index
    %4 = vector.load %arg3[%c0_2, %c0_3] : memref<32x32xbf16, #tpu.memory_space<vmem>>, vector<32x32xbf16>
    %cst = arith.constant dense<0.000000e+00> : vector<128x32xf32>
    %5 = tpu.matmul %3, %4, %cst {dimension_numbers = #tpu.dot_dimension_numbers<[1], [0], [0], [1], [0, 0, 1, 1], [], []>} : vector<128x32xbf16>, vector<32x32xbf16>, vector<128x32xf32> -> vector<128x32xf32>
    %c0_4 = arith.constant 0 : index
    %c0_5 = arith.constant 0 : index
    %6 = vector.load %arg4[%c0_4, %c0_5] : memref<1x32xf32, #tpu.memory_space<vmem>>, vector<1x32xf32>
    %7 = vector.broadcast %6 : vector<1x32xf32> to vector<128x32xf32>
    %8 = arith.addf %5, %7 : vector<128x32xf32>
    %cst_6 = arith.constant 8.000000e+00 : f32
    %9 = vector.broadcast %cst_6 : f32 to vector<128x32xf32>
    %10 = arith.mulf %8, %9 : vector<128x32xf32>
    %11 = math.roundeven %10 : vector<128x32xf32>
    %cst_7 = arith.constant -8.000000e+00 : f32
    %cst_8 = arith.constant 7.000000e+00 : f32
    %12 = vector.broadcast %cst_7 : f32 to vector<128x32xf32>
    %13 = arith.maximumf %12, %11 : vector<128x32xf32>
    %14 = vector.broadcast %cst_8 : f32 to vector<128x32xf32>
    %15 = arith.minimumf %14, %13 : vector<128x32xf32>
    %cst_9 = arith.constant 1.250000e-01 : f32
    %16 = vector.broadcast %cst_9 : f32 to vector<128x32xf32>
    %17 = arith.mulf %15, %16 : vector<128x32xf32>
    %18 = arith.truncf %17 : vector<128x32xf32> to vector<128x32xbf16>
    %c0_10 = arith.constant 0 : index
    %c0_11 = arith.constant 0 : index
    %19 = vector.load %arg5[%c0_10, %c0_11] : memref<128x32xbf16, #tpu.memory_space<vmem>>, vector<128x32xbf16>
    tpu.vector_store %arg5[%c0_10, %c0_11], %18 {strides = array<i32>} : memref<128x32xbf16, #tpu.memory_space<vmem>>, vector<128x32xbf16>,
    return
  }
  func.func @transform_0(%arg0: i32, %arg1: i32) -> (i32, i32) {
    %c0_i32 = arith.constant 0 : i32
    %c0_i32_0 = arith.constant 0 : i32
    return %arg0, %c0_i32 : i32, i32
  }
  func.func @transform_1(%arg0: i32, %arg1: i32) -> (i32, i32) {
    %c0_i32 = arith.constant 0 : i32
    %c0_i32_0 = arith.constant 0 : i32
    return %c0_i32, %arg1 : i32, i32
  }
  func.func @transform_2(%arg0: i32, %arg1: i32) -> (i32, i32) {
    %c0_i32 = arith.constant 0 : i32
    %c0_i32_0 = arith.constant 0 : i32
    return %c0_i32, %arg1 : i32, i32
  }
  func.func @transform_3(%arg0: i32, %arg1: i32) -> (i32, i32) {
    %c0_i32 = arith.constant 0 : i32
    return %arg0, %arg1 : i32, i32
  }
}

</mosaic_0001>

<bundles_post_ra>
// kernel: tpu_custom_call.1
= control target key start
LH: loop header
LB: loop body
LE: loop exit
PB: predicated region body
PF: predicated region fallthrough
CT: control target
= control target key end

     0   :  { %s951_s12 = smov 0   ;;  %s953_s13 = smov 0   ;;  %s1083_s0 = inlined_call_operand.vmem [shape: f32[256,32], index: 0, kind: input, shape index: {}]   ;;  %s1084_s1 = inlined_call_operand.vmem [shape: bf16[32,32], index: 1, kind: input, shape index: {}]   ;;  %s1085_s2 = inlined_call_operand.vmem [shape: f32[1,32], index: 2, kind: input, shape index: {}]   ;;  %s1086_s3 = inlined_call_operand.vmem [shape: bf16[256,32], index: 3, kind: output, shape index: {}]  }
   0x1   :  { %s955_s14 = smov 0  }
   0x2 LB: > { %s25_s15 = sadd.s32 1, %s925_s13  ;;  %p765_p0 = scmp.ge.s32.totalorder %s929_s14, 1  ;;  %s929_s14 = sphi %s955_s14, %s13_s14   ;;  %s925_s13 = sphi %s953_s13, %s1088_s13   ;;  %s921_s12 = sphi %s951_s12, %s1087_s12  }
   0x3   : > { %p27_p1 = scmp.ge.s32.totalorder %s25_s15, 2  ;;  %p169_p2 = scmp.lt.s32.totalorder %s929_s14, 3 }
   0x5   : > { %s1090_s15 = smov (%p27_p1, %s25_s15), 0  ;;  %p170_p3 = pnand %p765_p0, %p169_p2 }
   0x6   : > { %v905_v0 = vld [vmem:[%s1084_s1] sm:$0xff] (!%p170_p3)   ;;  %s766_s18 = sshll.u32 (!%p170_p3), %s921_s12, 4  ;;  %v906_v1 = vld [vmem:[%s1084_s1 + $0x8] sm:$0xff] (!%p170_p3)   ;;  %vm334_vm0 = vcmask (!%p170_p3), 261120   ;;  %vm640_vm1 = vcmask (!%p170_p3), 257024  }
   0x7   : > { %173 = sbr.rel (%p170_p3) target bundleno = 285 (0x11d), region = 32  ;;  %p204_p4 = scmp.lt.s32.totalorder (!%p170_p3), %s766_s18, 31  ;;  %825 = vmatprep.subr.bf16.mxu0 (!%p170_p3), %v905_v0  ;;  %845 = vmatprep.subr.bf16.mxu1 (!%p170_p3), %v905_v0 }
   0x8   : > { %826 = vmatpush3.bf16.msra.mxu0 (!%p170_p3), %v905_v0  ;;  %847 = vmatpush3.bf16.msra.mxu1 (!%p170_p3), %v905_v0 }
   0x9   : > { %827 = vmatprep.subr.bf16.mxu0 (!%p170_p3), %v906_v1  ;;  %846 = vmatprep.subr.bf16.mxu1 (!%p170_p3), %v906_v1 }
   0xc   : > { %828 = vmatpush3.bf16.msra.mxu0 (!%p170_p3), %v906_v1  ;;  %848 = vmatpush3.bf16.msra.mxu1 (!%p170_p3), %v906_v1 }
   0xe   : > { %s1092_s18 = smov (!%p204_p4, %s766_s18), 31 }
   0xf   : > { %s767_s21 = sshll.u32 %s1092_s18, 3  ;;  %s769_s27 = sshll.u32 %s1092_s18, 2 }
  0x10   : > { %s981_s24 = scalar_lea.vmem %s1083_s0, %s767_s21  ;;  %s1032_s30 = scalar_lea.vmem %s1086_s3, %s769_s27 }
  0x11   : > { %v230_v2 = vld [vmem:[%s981_s24] sm:$0xff]  ;;  %v231_v3 = vld [vmem:[%s981_s24 + $0x8] sm:$0xff]  ;;  %v232_v9 = vld [vmem:[%s981_s24 + $0x10] sm:$0xff] }
  0x12   : > { %v238_v4 = vld [vmem:[%s981_s24 + $0x40] sm:$0xff]  ;;  %v246_v5 = vmul.f32 4.0, %v230_v2  ;;  %v247_v6 = vmul.f32 4.0, %v231_v3  ;;  %v239_v7 = vld [vmem:[%s981_s24 + $0x48] sm:$0xff]  ;;  %v233_v10 = vld [vmem:[%s981_s24 + $0x18] sm:$0xff]  ;;  %v248_v12 = vmul.f32 4.0, %v232_v9 }
  0x13   : > { %v254_v8 = vmul.f32 4.0, %v238_v4  ;;  %v255_v11 = vmul.f32 4.0, %v239_v7  ;;  %v249_v13 = vmul.f32 4.0, %v233_v10  ;;  %v240_v14 = vld [vmem:[%s981_s24 + $0x50] sm:$0xff]  ;;  %v241_v15 = vld [vmem:[%s981_s24 + $0x58] sm:$0xff]  ;;  %v234_v40 = vld [vmem:[%s981_s24 + $0x20] sm:$0xff] }
  0x14   : > { %v849_v16 = vround.rtne.f32 %v246_v5  ;;  %v850_v17 = vround.rtne.f32 %v247_v6  ;;  %v256_v19 = vmul.f32 4.0, %v240_v14  ;;  %v851_v21 = vround.rtne.f32 %v248_v12  ;;  %v235_v41 = vld [vmem:[%s981_s24 + $0x28] sm:$0xff]  ;;  %v242_v46 = vld [vmem:[%s981_s24 + $0x60] sm:$0xff]  ;;  %v236_v52 = vld [vmem:[%s981_s24 + $0x30] sm:$0xff] }
  0x15   : > { %v857_v18 = vround.rtne.f32 %v254_v8  ;;  %v858_v20 = vround.rtne.f32 %v255_v11  ;;  %v852_v22 = vround.rtne.f32 %v249_v13  ;;  %v257_v23 = vmul.f32 4.0, %v241_v15  ;;  %v243_v51 = vld [vmem:[%s981_s24 + $0x68] sm:$0xff]  ;;  %v237_v57 = vld [vmem:[%s981_s24 + $0x38] sm:$0xff]  ;;  %v244_v58 = vld [vmem:[%s981_s24 + $0x70] sm:$0xff] }
  0x16   : > { %v278_v24 = vmax.f32 %v849_v16, 0.0  ;;  %v279_v25 = vmax.f32 %v850_v17, 0.0  ;;  %v859_v27 = vround.rtne.f32 %v256_v19  ;;  %v280_v29 = vmax.f32 %v851_v21, 0.0  ;;  %v245_v3 = vld [vmem:[%s981_s24 + $0x78] sm:$0xff] }
  0x17   : > { %v286_v26 = vmax.f32 %v857_v18, 0.0  ;;  %v287_v28 = vmax.f32 %v858_v20, 0.0  ;;  %v281_v30 = vmax.f32 %v852_v22, 0.0  ;;  %v860_v31 = vround.rtne.f32 %v257_v23 }
  0x18   : > { %v294_v32 = vmin.f32 %v278_v24, 15.0  ;;  %v295_v33 = vmin.f32 %v279_v25, 15.0  ;;  %v288_v35 = vmax.f32 %v859_v27, 0.0  ;;  %v296_v37 = vmin.f32 %v280_v29, 15.0 }
  0x19   : > { %v302_v34 = vmin.f32 %v286_v26, 15.0  ;;  %v303_v36 = vmin.f32 %v287_v28, 15.0  ;;  %v297_v38 = vmin.f32 %v281_v30, 15.0  ;;  %v289_v39 = vmax.f32 %v860_v31, 0.0 }
  0x1a   : > { %v310_v42 = vmul.f32 0.25, %v294_v32  ;;  %v311_v43 = vmul.f32 0.25, %v295_v33  ;;  %v304_v45 = vmin.f32 %v288_v35, 15.0  ;;  %v312_v48 = vmul.f32 0.25, %v296_v37 }
  0x1b   : > { %v318_v44 = vmul.f32 0.25, %v302_v34  ;;  %v319_v47 = vmul.f32 0.25, %v303_v36  ;;  %v313_v49 = vmul.f32 0.25, %v297_v38  ;;  %v305_v50 = vmin.f32 %v289_v39, 15.0 }
  0x1c   : > { %v326_v53 = vpack.c.bf16 %v311_v43, %v310_v42  ;;  %v320_v54 = vmul.f32 0.25, %v304_v45  ;;  %v250_v55 = vmul.f32 4.0, %v234_v40  ;;  %v251_v56 = vmul.f32 4.0, %v235_v41 }
  0x1d   : > { %v330_v59 = vpack.c.bf16 %v319_v47, %v318_v44  ;;  %v327_v60 = vpack.c.bf16 %v313_v49, %v312_v48  ;;  %v321_v61 = vmul.f32 0.25, %v305_v50  ;;  %v258_v62 = vmul.f32 4.0, %v242_v46  ;;  %v1018_v50 = vld [vmem:[%s1085_s2] ss:$0 sm:$0xff] }
  0x1e   : > { %335 = vst.msk [vmem:[#allocation2] sm:$0xff] %vm334_vm0, %v326_v53  ;;  %v853_v63 = vround.rtne.f32 %v250_v55  ;;  %v854_v0 = vround.rtne.f32 %v251_v56  ;;  %v259_v1 = vmul.f32 4.0, %v243_v51  ;;  %v252_v2 = vmul.f32 4.0, %v236_v52 }
  0x1f   : > { %339 = vst.msk [vmem:[#allocation2 + $0x20] sm:$0xff] %vm334_vm0, %v330_v59  ;;  %336 = vst.msk [vmem:[#allocation2 + $0x8] sm:$0xff] %vm334_vm0, %v327_v60  ;;  %v331_v4 = vpack.c.bf16 %v321_v61, %v320_v54  ;;  %v861_v5 = vround.rtne.f32 %v258_v62  ;;  %v253_v6 = vmul.f32 4.0, %v237_v57  ;;  %v260_v7 = vmul.f32 4.0, %v244_v58 }
  0x20   : > { %v282_v8 = vmax.f32 %v853_v63, 0.0  ;;  %v283_v9 = vmax.f32 %v854_v0, 0.0  ;;  %v862_v10 = vround.rtne.f32 %v259_v1  ;;  %v855_v11 = vround.rtne.f32 %v252_v2 }
  0x21   : > { %340 = vst.msk [vmem:[#allocation2 + $0x28] sm:$0xff] %vm334_vm0, %v331_v4  ;;  %v290_v12 = vmax.f32 %v861_v5, 0.0  ;;  %v856_v13 = vround.rtne.f32 %v253_v6  ;;  %v261_v14 = vmul.f32 4.0, %v245_v3  ;;  %v863_v15 = vround.rtne.f32 %v260_v7 }
  0x22   : > { %v298_v16 = vmin.f32 %v282_v8, 15.0  ;;  %v299_v17 = vmin.f32 %v283_v9, 15.0  ;;  %v291_v18 = vmax.f32 %v862_v10, 0.0  ;;  %v284_v19 = vmax.f32 %v855_v11, 0.0 }
  0x23   : > { %v306_v20 = vmin.f32 %v290_v12, 15.0  ;;  %v285_v21 = vmax.f32 %v856_v13, 0.0  ;;  %v864_v22 = vround.rtne.f32 %v261_v14  ;;  %v292_v23 = vmax.f32 %v863_v15, 0.0 }
  0x24   : > { %v314_v24 = vmul.f32 0.25, %v298_v16  ;;  %v315_v25 = vmul.f32 0.25, %v299_v17  ;;  %v307_v26 = vmin.f32 %v291_v18, 15.0  ;;  %v300_v27 = vmin.f32 %v284_v19, 15.0 }
  0x25   : > { %v343_v28 = vld [vmem:[#allocation2] sm:$0xff]  ;;  %v322_v29 = vmul.f32 0.25, %v306_v20  ;;  %v301_v30 = vmin.f32 %v285_v21, 15.0  ;;  %v293_v31 = vmax.f32 %v864_v22, 0.0  ;;  %v308_v32 = vmin.f32 %v292_v23, 15.0 }
  0x26   : > { %829 = vmatprep.mubr.msk.bf16.mxu0 %vm334_vm0, %v343_v28  ;;  %v347_v33 = vld [vmem:[#allocation2 + $0x20] sm:$0xff]  ;;  %v344_v34 = vld [vmem:[#allocation2 + $0x8] sm:$0xff]  ;;  %v328_v35 = vpack.c.bf16 %v315_v25, %v314_v24  ;;  %v323_v36 = vmul.f32 0.25, %v307_v26  ;;  %v316_v37 = vmul.f32 0.25, %v300_v27 }
  0x27   : > { %837 = vmatprep.mubr.msk.bf16.mxu1 %vm334_vm0, %v347_v33  ;;  %830 = vmatmul.mubr.msk.bf16.vlgmr.msra.gmra.mrb[0].mxu0 %vm334_vm0, %v344_v34  ;;  %v317_v38 = vmul.f32 0.25, %v301_v30  ;;  %v309_v39 = vmin.f32 %v293_v31, 15.0  ;;  %v324_v40 = vmul.f32 0.25, %v308_v32 }
  0x28   : > { %v348_v41 = vld [vmem:[#allocation2 + $0x28] sm:$0xff]  ;;  %337 = vst.msk [vmem:[#allocation2 + $0x10] sm:$0xff] %vm334_vm0, %v328_v35  ;;  %v332_v42 = vpack.c.bf16 %v323_v36, %v322_v29 }
  0x29   : > { %838 = vmatmul.mubr.msk.bf16.vlgmr.msra.gmra.mrb[0].mxu1 %vm334_vm0, %v348_v41  ;;  %v329_v43 = vpack.c.bf16 %v317_v38, %v316_v37  ;;  %v325_v44 = vmul.f32 0.25, %v309_v39 }
  0x2a   : > { %341 = vst.msk [vmem:[#allocation2 + $0x30] sm:$0xff] %vm334_vm0, %v332_v42 }
  0x2b   : > { %338 = vst.msk [vmem:[#allocation2 + $0x18] sm:$0xff] %vm334_vm0, %v329_v43  ;;  %v333_v45 = vpack.c.bf16 %v325_v44, %v324_v40 }
  0x2d   : > { %342 = vst.msk [vmem:[#allocation2 + $0x38] sm:$0xff] %vm334_vm0, %v333_v45 }
  0x2f   : > { %v345_v46 = vld [vmem:[#allocation2 + $0x10] sm:$0xff] }
  0x30   : > { %833 = vmatprep.mubr.msk.bf16.mxu0 %vm334_vm0, %v345_v46 }
  0x31   : > { %v349_v47 = vld [vmem:[#allocation2 + $0x30] sm:$0xff] }
  0x32   : > { %841 = vmatprep.mubr.msk.bf16.mxu1 %vm334_vm0, %v349_v47  ;;  %v346_v48 = vld [vmem:[#allocation2 + $0x18] sm:$0xff] }
  0x33   : > { %834 = vmatmul.mubr.msk.bf16.gmra.mrb[4].mxu0 %vm334_vm0, %v346_v48 }
  0x34   : > { %v350_v49 = vld [vmem:[#allocation2 + $0x38] sm:$0xff] }
  0x35   : > { %842 = vmatmul.mubr.msk.bf16.gmra.mrb[4].mxu1 %vm334_vm0, %v350_v49 }
  0xfa   : > { %v831_v51 = vpop.f32.mrb[0].mxu0 }
  0xfb   : > { %v442_v52 = vadd.f32 %v831_v51, %v1018_v50  ;;  %v433_v53 = vpop.f32.mrb[1].mxu0 }
  0xfc   : > { %v839_v54 = vpop.f32.mrb[0].mxu1  ;;  %v434_v55 = vadd.f32 %v1018_v50, %v433_v53  ;;  %v832_v56 = vpop.f32.mrb[2].mxu0 }
  0xfd   : > { %v498_v57 = vmul.f32 8.0, %v442_v52  ;;  %v474_v58 = vadd.f32 %v839_v54, %v1018_v50  ;;  %v465_v59 = vpop.f32.mrb[1].mxu1  ;;  %v445_v60 = vadd.f32 %v832_v56, %v1018_v50  ;;  %v436_v61 = vpop.f32.mrb[3].mxu0 }
  0xfe   : > { %v496_v62 = vmul.f32 8.0, %v434_v55  ;;  %v466_v63 = vadd.f32 %v1018_v50, %v465_v59  ;;  %v840_v0 = vpop.f32.mrb[2].mxu1  ;;  %v437_v1 = vadd.f32 %v1018_v50, %v436_v61 }
  0xff   : > { %v867_v2 = vround.rtne.f32 %v498_v57  ;;  %v506_v3 = vmul.f32 8.0, %v474_v58  ;;  %v499_v4 = vmul.f32 8.0, %v445_v60  ;;  %v477_v5 = vadd.f32 %v840_v0, %v1018_v50  ;;  %v468_v6 = vpop.f32.mrb[3].mxu1 }
 0x100   : > { %v865_v7 = vround.rtne.f32 %v496_v62  ;;  %v504_v8 = vmul.f32 8.0, %v466_v63  ;;  %v497_v9 = vmul.f32 8.0, %v437_v1  ;;  %v469_v10 = vadd.f32 %v1018_v50, %v468_v6 }
 0x101   : > { %v530_v11 = vmax.f32 %v867_v2, -8.0  ;;  %v875_v12 = vround.rtne.f32 %v506_v3  ;;  %v868_v13 = vround.rtne.f32 %v499_v4  ;;  %v507_v14 = vmul.f32 8.0, %v477_v5 }
 0x102   : > { %v528_v15 = vmax.f32 %v865_v7, -8.0  ;;  %v873_v16 = vround.rtne.f32 %v504_v8  ;;  %v866_v17 = vround.rtne.f32 %v497_v9  ;;  %v505_v18 = vmul.f32 8.0, %v469_v10 }
 0x103   : > { %v546_v19 = vmin.f32 %v530_v11, 7.0  ;;  %v538_v20 = vmax.f32 %v875_v12, -8.0  ;;  %v531_v21 = vmax.f32 %v868_v13, -8.0  ;;  %v876_v22 = vround.rtne.f32 %v507_v14 }
 0x104   : > { %v544_v23 = vmin.f32 %v528_v15, 7.0  ;;  %v536_v24 = vmax.f32 %v873_v16, -8.0  ;;  %v529_v25 = vmax.f32 %v866_v17, -8.0  ;;  %v874_v26 = vround.rtne.f32 %v505_v18 }
 0x105   : > { %v562_v27 = vmul.f32 0.125, %v546_v19  ;;  %v554_v28 = vmin.f32 %v538_v20, 7.0  ;;  %v547_v29 = vmin.f32 %v531_v21, 7.0  ;;  %v539_v30 = vmax.f32 %v876_v22, -8.0 }
 0x106   : > { %v560_v31 = vmul.f32 0.125, %v544_v23  ;;  %v552_v32 = vmin.f32 %v536_v24, 7.0  ;;  %v545_v33 = vmin.f32 %v529_v25, 7.0  ;;  %v537_v34 = vmax.f32 %v874_v26, -8.0  ;;  %v835_v35 = vpop.f32.mrb[4].mxu0 }
 0x107   : > { %v801_v36 = vpack.c.bf16 %v562_v27, %v562_v27  ;;  %v570_v37 = vmul.f32 0.125, %v554_v28  ;;  %v563_v38 = vmul.f32 0.125, %v547_v29  ;;  %v555_v39 = vmin.f32 %v539_v30, 7.0  ;;  %v449_v40 = vpop.f32.mrb[5].mxu0 }
 0x108   : > { %v799_v41 = vpack.c.bf16 %v560_v31, %v560_v31  ;;  %v568_v42 = vmul.f32 0.125, %v552_v32  ;;  %v561_v43 = vmul.f32 0.125, %v545_v33  ;;  %v553_v44 = vmin.f32 %v537_v34, 7.0  ;;  %v843_v45 = vpop.f32.mrb[4].mxu1  ;;  %v836_v46 = vpop.f32.mrb[6].mxu0 }
 0x109   : > { %643 = vst.msk [vmem:[%s1032_s30 + $0x8] sm:$0xf] %vm640_vm1, %v801_v36  ;;  %v809_v47 = vpack.c.bf16 %v570_v37, %v570_v37  ;;  %v802_v48 = vpack.c.bf16 %v563_v38, %v563_v38  ;;  %v571_v49 = vmul.f32 0.125, %v555_v39  ;;  %v458_v51 = vadd.f32 %v835_v35, %v1018_v50  ;;  %v481_v52 = vpop.f32.mrb[5].mxu1  ;;  %v452_v53 = vpop.f32.mrb[7].mxu0 }
 0x10a   : > { %641 = vst.msk [vmem:[%s1032_s30] sm:$0xf] %vm640_vm1, %v799_v41  ;;  %v807_v54 = vpack.c.bf16 %v568_v42, %v568_v42  ;;  %v800_v55 = vpack.c.bf16 %v561_v43, %v561_v43  ;;  %v569_v56 = vmul.f32 0.125, %v553_v44  ;;  %v490_v57 = vadd.f32 %v843_v45, %v1018_v50  ;;  %v844_v58 = vpop.f32.mrb[6].mxu1 }
 0x10b   : > { %651 = vst.msk [vmem:[%s1032_s30 + $0x28] sm:$0xf] %vm640_vm1, %v809_v47  ;;  %644 = vst.msk [vmem:[%s1032_s30 + $0xc] sm:$0xf] %vm640_vm1, %v802_v48  ;;  %v810_v59 = vpack.c.bf16 %v571_v49, %v571_v49  ;;  %v502_v60 = vmul.f32 8.0, %v458_v51  ;;  %v450_v61 = vadd.f32 %v1018_v50, %v449_v40  ;;  %v482_v62 = vadd.f32 %v1018_v50, %v481_v52  ;;  %v484_v63 = vpop.f32.mrb[7].mxu1 }
 0x10c   : > { %649 = vst.msk [vmem:[%s1032_s30 + $0x20] sm:$0xf] %vm640_vm1, %v807_v54  ;;  %642 = vst.msk [vmem:[%s1032_s30 + $0x4] sm:$0xf] %vm640_vm1, %v800_v55  ;;  %v808_v0 = vpack.c.bf16 %v569_v56, %v569_v56  ;;  %v510_v1 = vmul.f32 8.0, %v490_v57  ;;  %v461_v2 = vadd.f32 %v836_v46, %v1018_v50  ;;  %v493_v3 = vadd.f32 %v844_v58, %v1018_v50 }
 0x10d   : > { %652 = vst.msk [vmem:[%s1032_s30 + $0x2c] sm:$0xf] %vm640_vm1, %v810_v59  ;;  %v871_v4 = vround.rtne.f32 %v502_v60  ;;  %v500_v5 = vmul.f32 8.0, %v450_v61  ;;  %v508_v6 = vmul.f32 8.0, %v482_v62  ;;  %v453_v7 = vadd.f32 %v1018_v50, %v452_v53 }
 0x10e   : > { %650 = vst.msk [vmem:[%s1032_s30 + $0x24] sm:$0xf] %vm640_vm1, %v808_v0  ;;  %v879_v8 = vround.rtne.f32 %v510_v1  ;;  %v503_v9 = vmul.f32 8.0, %v461_v2  ;;  %v511_v10 = vmul.f32 8.0, %v493_v3  ;;  %v485_v11 = vadd.f32 %v1018_v50, %v484_v63 }
 0x10f   : > { %v534_v12 = vmax.f32 %v871_v4, -8.0  ;;  %v869_v13 = vround.rtne.f32 %v500_v5  ;;  %v877_v14 = vround.rtne.f32 %v508_v6  ;;  %v501_v15 = vmul.f32 8.0, %v453_v7 }
 0x110   : > { %v542_v16 = vmax.f32 %v879_v8, -8.0  ;;  %v872_v17 = vround.rtne.f32 %v503_v9  ;;  %v880_v18 = vround.rtne.f32 %v511_v10  ;;  %v509_v19 = vmul.f32 8.0, %v485_v11 }
 0x111   : > { %v550_v20 = vmin.f32 %v534_v12, 7.0  ;;  %v532_v21 = vmax.f32 %v869_v13, -8.0  ;;  %v540_v22 = vmax.f32 %v877_v14, -8.0  ;;  %v870_v23 = vround.rtne.f32 %v501_v15 }
 0x112   : > { %v558_v24 = vmin.f32 %v542_v16, 7.0  ;;  %v535_v25 = vmax.f32 %v872_v17, -8.0  ;;  %v543_v26 = vmax.f32 %v880_v18, -8.0  ;;  %v878_v27 = vround.rtne.f32 %v509_v19 }
 0x113   : > { %v566_v28 = vmul.f32 0.125, %v550_v20  ;;  %v548_v29 = vmin.f32 %v532_v21, 7.0  ;;  %v556_v50 = vmin.f32 %v540_v22, 7.0  ;;  %v533_v30 = vmax.f32 %v870_v23, -8.0 }
 0x114   : > { %v574_v31 = vmul.f32 0.125, %v558_v24  ;;  %v551_v32 = vmin.f32 %v535_v25, 7.0  ;;  %v559_v33 = vmin.f32 %v543_v26, 7.0  ;;  %v541_v34 = vmax.f32 %v878_v27, -8.0 }
 0x115   : > { %v805_v35 = vpack.c.bf16 %v566_v28, %v566_v28  ;;  %v564_v36 = vmul.f32 0.125, %v548_v29  ;;  %v572_v37 = vmul.f32 0.125, %v556_v50  ;;  %v549_v38 = vmin.f32 %v533_v30, 7.0 }
 0x116   : > { %v813_v39 = vpack.c.bf16 %v574_v31, %v574_v31  ;;  %v567_v40 = vmul.f32 0.125, %v551_v32  ;;  %v575_v41 = vmul.f32 0.125, %v559_v33  ;;  %v557_v42 = vmin.f32 %v541_v34, 7.0 }
 0x117   : > { %647 = vst.msk [vmem:[%s1032_s30 + $0x18] sm:$0xf] %vm640_vm1, %v805_v35  ;;  %v803_v43 = vpack.c.bf16 %v564_v36, %v564_v36  ;;  %v811_v44 = vpack.c.bf16 %v572_v37, %v572_v37  ;;  %v565_v45 = vmul.f32 0.125, %v549_v38 }
 0x118   : > { %655 = vst.msk [vmem:[%s1032_s30 + $0x38] sm:$0xf] %vm640_vm1, %v813_v39  ;;  %v806_v46 = vpack.c.bf16 %v567_v40, %v567_v40  ;;  %v814_v47 = vpack.c.bf16 %v575_v41, %v575_v41  ;;  %v573_v48 = vmul.f32 0.125, %v557_v42 }
 0x119   : > { %645 = vst.msk [vmem:[%s1032_s30 + $0x10] sm:$0xf] %vm640_vm1, %v803_v43  ;;  %653 = vst.msk [vmem:[%s1032_s30 + $0x30] sm:$0xf] %vm640_vm1, %v811_v44  ;;  %v804_v49 = vpack.c.bf16 %v565_v45, %v565_v45 }
 0x11a   : > { %648 = vst.msk [vmem:[%s1032_s30 + $0x1c] sm:$0xf] %vm640_vm1, %v806_v46  ;;  %656 = vst.msk [vmem:[%s1032_s30 + $0x3c] sm:$0xf] %vm640_vm1, %v814_v47  ;;  %v812_v51 = vpack.c.bf16 %v573_v48, %v573_v48 }
 0x11b   : > { %646 = vst.msk [vmem:[%s1032_s30 + $0x14] sm:$0xf] %vm640_vm1, %v804_v49 }
 0x11c   : > { %654 = vst.msk [vmem:[%s1032_s30 + $0x34] sm:$0xf] %vm640_vm1, %v812_v51 }
 0x11d PF: > { %s13_s14 = sadd.s32 1, %s929_s14   ;;  %s1087_s12 = smov %s925_s13 }
 0x11e   : > { %p10_p5 = scmp.ge.s32.totalorder %s13_s14, 4   ;;  %s1088_s13 = smov %s1090_s15 }
 0x120   :  { %12 = sbr.rel (!%p10_p5) target bundleno = 2 (0x2), region = 72 }

</bundles_post_ra>
